<compile_context>
chip_gen: v6e
topology: v6e:2x2x1
jax: 0.10.0
libtpu: 0.0.40
codegen_flags: <defaults>
</compile_context>

<pallas_src>
import jax
import jax.numpy as jnp
import numpy as np
from jax.experimental import pallas as pl
from jax.experimental.pallas import tpu as pltpu


# ---------------------------------------------------------------------------
# Fused FFN kernel: out_tile = relu(x_tile @ W1[:, h_tile]) @ W2[h_tile, :]
# accumulated over the hidden grid axis.
# ---------------------------------------------------------------------------
def _ffn_kernel(x_ref, w1_ref, w2_ref, o_ref, acc_ref):
    # x_ref: (tm, D)   w1_ref: (D, th)   w2_ref: (th, O)   o_ref: (tm, O)
    h_idx = pl.program_id(1)

    @pl.when(h_idx == 0)
    def _():
        acc_ref[...] = jnp.zeros_like(acc_ref)

    # dense1 chunk + ReLU (hidden activations stay in VMEM / vregs)
    h = jnp.dot(x_ref[...], w1_ref[...], preferred_element_type=jnp.float32)
    h = jnp.maximum(h, 0.0)

    # dense2 chunk, accumulated in f32
    acc_ref[...] += jnp.dot(h.astype(w2_ref.dtype), w2_ref[...],
                            preferred_element_type=jnp.float32)

    @pl.when(h_idx == pl.num_programs(1) - 1)
    def _():
        o_ref[...] = acc_ref[...].astype(o_ref.dtype)


def position_wise_ffn(x, w1, w2, *, block_m=256, block_h=512):
    """x: [..., D]; w1: [D, H]; w2: [H, O]  ->  [..., O]."""
    orig_shape = x.shape
    D = orig_shape[-1]
    H, O = w1.shape[1], w2.shape[1]
    M = int(np.prod(orig_shape[:-1]))
    x2 = x.reshape(M, D)

    # Tile sizes: use the requested block if it divides evenly (and satisfies
    # the (8,128) rule), otherwise fall back to the full dimension (always legal).
    tm = block_m if (M % block_m == 0) else M
    th = block_h if (H % block_h == 0) else H

    out = pl.pallas_call(
        _ffn_kernel,
        out_shape=jax.ShapeDtypeStruct((M, O), x.dtype),
        grid_spec=pltpu.PrefetchScalarGridSpec(
            num_scalar_prefetch=0,
            grid=(M // tm, H // th),          # hidden (reduction) axis is last
            in_specs=[
                pl.BlockSpec((tm, D), lambda i, h: (i, 0)),
                pl.BlockSpec((D, th), lambda i, h: (0, h)),
                pl.BlockSpec((th, O), lambda i, h: (h, 0)),
            ],
            out_specs=pl.BlockSpec((tm, O), lambda i, h: (i, 0)),
            scratch_shapes=[pltpu.VMEM((tm, O), jnp.float32)],
        ),
        compiler_params=pltpu.CompilerParams(
            dimension_semantics=("parallel", "arbitrary")),
    )(x2, w1, w2)
    return out.reshape(*orig_shape[:-1], O)


# ---------------------------------------------------------------------------
# Pure-JAX reference for verification
# ---------------------------------------------------------------------------
def _reference(x, w1, w2):
    return jnp.maximum(x @ w1, 0.0) @ w2


if __name__ == "__main__":
    key = jax.random.PRNGKey(0)
    kx, k1, k2 = jax.random.split(key, 3)

    # Small shapes consistent with the module: X is [batch, seq, d_model]
    batch, seq, d_model = 2, 8, 32
    ffn_num_hiddens, ffn_num_outputs = 64, 32

    X  = jax.random.normal(kx, (batch, seq, d_model), jnp.float32)
    # use_bias=False -> no bias parameters. Weights stored [in, out] (no transposes).
    W1 = jax.random.normal(k1, (d_model, ffn_num_hiddens), jnp.float32) / np.sqrt(d_model)
    W2 = jax.random.normal(k2, (ffn_num_hiddens, ffn_num_outputs), jnp.float32) / np.sqrt(ffn_num_hiddens)

    out = position_wise_ffn(X, W1, W2)
    out = jax.block_until_ready(out)

    ref = _reference(X, W1, W2)
    np.testing.assert_allclose(np.asarray(out), np.asarray(ref),
                               rtol=1e-5, atol=1e-5)
    print("KERNEL_OK")
</pallas_src>

<mosaic_0001>
module attributes {stable_mosaic.version = 11 : i64} {
  func.func @_ffn_kernel(%arg0: i32, %arg1: i32, %arg2: memref<16x32xf32, #tpu.memory_space<vmem>>, %arg3: memref<32x64xf32, #tpu.memory_space<vmem>>, %arg4: memref<64x32xf32, #tpu.memory_space<vmem>>, %arg5: memref<16x32xf32, #tpu.memory_space<vmem>>, %arg6: memref<16x32xf32, #tpu.memory_space<vmem>>) attributes {dimension_semantics = [#tpu.dimension_semantics<parallel>, #tpu.dimension_semantics<arbitrary>], iteration_bounds = array<i64: 1, 1>, scalar_prefetch = 0 : i64, scratch_operands = 1 : i64, tpu.core_type = #tpu.core_type<tc>, window_params = [{transform_indices = @transform_0, window_bounds = array<i64: 16, 32>}, {transform_indices = @transform_1, window_bounds = array<i64: 32, 64>}, {transform_indices = @transform_2, window_bounds = array<i64: 64, 32>}, {transform_indices = @transform_3, window_bounds = array<i64: 16, 32>}]} {
    %c0_i32 = arith.constant 0 : i32
    %0 = arith.cmpi eq, %arg1, %c0_i32 : i32
    %1 = arith.extui %0 : i1 to i32
    %c0_i32_0 = arith.constant 0 : i32
    %2 = arith.cmpi ne, %1, %c0_i32_0 : i32
    scf.if %2 {
      %cst_14 = arith.constant 0.000000e+00 : f32
      %16 = vector.broadcast %cst_14 : f32 to vector<16x32xf32>
      %c0_15 = arith.constant 0 : index
      %c0_16 = arith.constant 0 : index
      %17 = vector.load %arg6[%c0_15, %c0_16] : memref<16x32xf32, #tpu.memory_space<vmem>>, vector<16x32xf32>
      tpu.vector_store %arg6[%c0_15, %c0_16], %16 {strides = array<i32>} : memref<16x32xf32, #tpu.memory_space<vmem>>, vector<16x32xf32>,
    } else {
    }
    %c0 = arith.constant 0 : index
    %c0_1 = arith.constant 0 : index
    %3 = vector.load %arg2[%c0, %c0_1] : memref<16x32xf32, #tpu.memory_space<vmem>>, vector<16x32xf32>
    %c0_2 = arith.constant 0 : index
    %c0_3 = arith.constant 0 : index
    %4 = vector.load %arg3[%c0_2, %c0_3] : memref<32x64xf32, #tpu.memory_space<vmem>>, vector<32x64xf32>
    %cst = arith.constant dense<0.000000e+00> : vector<16x64xf32>
    %5 = tpu.matmul %3, %4, %cst {dimension_numbers = #tpu.dot_dimension_numbers<[1], [0], [0], [1], [0, 0, 1, 1], [], []>} : vector<16x32xf32>, vector<32x64xf32>, vector<16x64xf32> -> vector<16x64xf32>
    %cst_4 = arith.constant 0.000000e+00 : f32
    %6 = vector.broadcast %cst_4 : f32 to vector<16x64xf32>
    %7 = arith.maximumf %5, %6 : vector<16x64xf32>
    %c0_5 = arith.constant 0 : index
    %c0_6 = arith.constant 0 : index
    %8 = vector.load %arg6[%c0_5, %c0_6] : memref<16x32xf32, #tpu.memory_space<vmem>>, vector<16x32xf32>
    %c0_7 = arith.constant 0 : index
    %c0_8 = arith.constant 0 : index
    %9 = vector.load %arg4[%c0_7, %c0_8] : memref<64x32xf32, #tpu.memory_space<vmem>>, vector<64x32xf32>
    %cst_9 = arith.constant dense<0.000000e+00> : vector<16x32xf32>
    %10 = tpu.matmul %7, %9, %cst_9 {dimension_numbers = #tpu.dot_dimension_numbers<[1], [0], [0], [1], [0, 0, 1, 1], [], []>} : vector<16x64xf32>, vector<64x32xf32>, vector<16x32xf32> -> vector<16x32xf32>
    %11 = arith.addf %8, %10 : vector<16x32xf32>
    %c0_10 = arith.constant 0 : index
    %c0_11 = arith.constant 0 : index
    %12 = vector.load %arg6[%c0_10, %c0_11] : memref<16x32xf32, #tpu.memory_space<vmem>>, vector<16x32xf32>
    tpu.vector_store %arg6[%c0_10, %c0_11], %11 {strides = array<i32>} : memref<16x32xf32, #tpu.memory_space<vmem>>, vector<16x32xf32>,
    %c0_i32_12 = arith.constant 0 : i32
    %13 = arith.cmpi eq, %arg1, %c0_i32_12 : i32
    %14 = arith.extui %13 : i1 to i32
    %c0_i32_13 = arith.constant 0 : i32
    %15 = arith.cmpi ne, %14, %c0_i32_13 : i32
    scf.if %15 {
      %c0_14 = arith.constant 0 : index
      %c0_15 = arith.constant 0 : index
      %16 = vector.load %arg6[%c0_14, %c0_15] : memref<16x32xf32, #tpu.memory_space<vmem>>, vector<16x32xf32>
      %c0_16 = arith.constant 0 : index
      %c0_17 = arith.constant 0 : index
      %17 = vector.load %arg5[%c0_16, %c0_17] : memref<16x32xf32, #tpu.memory_space<vmem>>, vector<16x32xf32>
      tpu.vector_store %arg5[%c0_16, %c0_17], %16 {strides = array<i32>} : memref<16x32xf32, #tpu.memory_space<vmem>>, vector<16x32xf32>,
    } else {
    }
    return
  }
  func.func @transform_0(%arg0: i32, %arg1: i32) -> (i32, i32) {
    %c0_i32 = arith.constant 0 : i32
    %c0_i32_0 = arith.constant 0 : i32
    return %arg0, %c0_i32 : i32, i32
  }
  func.func @transform_1(%arg0: i32, %arg1: i32) -> (i32, i32) {
    %c0_i32 = arith.constant 0 : i32
    %c0_i32_0 = arith.constant 0 : i32
    return %c0_i32, %arg1 : i32, i32
  }
  func.func @transform_2(%arg0: i32, %arg1: i32) -> (i32, i32) {
    %c0_i32 = arith.constant 0 : i32
    %c0_i32_0 = arith.constant 0 : i32
    return %arg1, %c0_i32 : i32, i32
  }
  func.func @transform_3(%arg0: i32, %arg1: i32) -> (i32, i32) {
    %c0_i32 = arith.constant 0 : i32
    %c0_i32_0 = arith.constant 0 : i32
    return %arg0, %c0_i32 : i32, i32
  }
}

</mosaic_0001>

<bundles_post_ra>
// kernel: tpu_custom_call.1
= control target key start
LH: loop header
LB: loop body
LE: loop exit
PB: predicated region body
PF: predicated region fallthrough
CT: control target
= control target key end

     0   :  { %vm19_vm0 = vcmask 261120   ;;  %s384_s0 = inlined_call_operand.vmem [shape: f32[16,32], index: 0, kind: input, shape index: {}]   ;;  %s385_s1 = inlined_call_operand.vmem [shape: f32[32,64], index: 1, kind: input, shape index: {}]   ;;  %s386_s2 = inlined_call_operand.vmem [shape: f32[64,32], index: 2, kind: input, shape index: {}]   ;;  %s387_s3 = inlined_call_operand.hbm [shape: f32[16,32], index: 3, kind: output, shape index: {}]  }
   0x1   :  { %v27_v0 = vld [vmem:[%s385_s1 + $0x18] sm:$0xff]  ;;  %v26_v1 = vld [vmem:[%s385_s1 + $0x10] sm:$0xff]  ;;  %v22_v2 = vld [vmem:[%s384_s0] sm:$0xff] }
   0x2   :  { %251 = vmatprep.subr.mxu0 %v27_v0  ;;  %v25_v3 = vld [vmem:[%s385_s1 + $0x8] sm:$0xff]  ;;  %259 = vmatprep.mubr.msk.f32.mxu0 %vm19_vm0, %v22_v2  ;;  %v121_v4 = vld [vmem:[%s386_s2 + $0x38] sm:$0xff]  ;;  %v120_v5 = vld [vmem:[%s386_s2 + $0x30] sm:$0xff] }
   0x3   :  { %252 = vmatpush3.msra.mxu0 %v27_v0  ;;  %262 = vmatprep.subr.mxu1 %v121_v4 }
   0x4   :  { %253 = vmatprep.subr.mxu0 %v26_v1 }
   0x5   :  { %8 = vsyncpa [#allocation4], 0  ;;  %254 = vmatpush3.msra.mxu0 %v26_v1  ;;  %v24_v6 = vld [vmem:[%s385_s1] sm:$0xff]  ;;  %263 = vmatpush3.msra.mxu1 %v121_v4  ;;  %v119_v7 = vld [vmem:[%s386_s2 + $0x28] sm:$0xff]  ;;  %v307_v14 = vmov 0.0   ;;  %vm122_vm1 = vcmask 523264  }
   0x6   :  { %255 = vmatprep.subr.mxu0 %v25_v3  ;;  %264 = vmatprep.subr.mxu1 %v120_v5  ;;  %v23_v8 = vld [vmem:[%s384_s0 + $0x8] sm:$0xff]  ;;  %v118_v9 = vld [vmem:[%s386_s2 + $0x20] sm:$0xff]  ;;  %v117_v10 = vld [vmem:[%s386_s2 + $0x18] sm:$0xff]  ;;  %21 = vst.msk [vmem:[#allocation2 + $0x8] sm:$0xff] %vm19_vm0, %v307_v14 }
   0x7   :  { %256 = vmatpush3.msra.mxu0 %v25_v3  ;;  %265 = vmatpush3.msra.mxu1 %v120_v5  ;;  %v116_v11 = vld [vmem:[%s386_s2 + $0x10] sm:$0xff]  ;;  %v115_v12 = vld [vmem:[%s386_s2 + $0x8] sm:$0xff]  ;;  %v114_v13 = vld [vmem:[%s386_s2] sm:$0xff]  ;;  %20 = vst.msk [vmem:[#allocation2] sm:$0xff] %vm19_vm0, %v307_v14  ;;  %s308_s2 = smov [#allocation3]  }
   0x8   :  { %257 = vmatprep.subr.mxu0 %v24_v6  ;;  %266 = vmatprep.subr.mxu1 %v119_v7  ;;  %s220_s11 = sshll.u32 %s308_s2, 4  ;;  %s221_s11 = int_to_ptr.vmem [resolvable:$true] %s220_s11 }
   0x9   :  { %258 = vmatpush3.msra.mxu0 %v24_v6  ;;  %267 = vmatpush3.msra.mxu1 %v119_v7  ;;  %s285_s12 = scalar_lea.vmem %s221_s11, 256  ;;  %p290_p1 = scmp.lt.s32.totalorder %s221_s11, %s221_s11 }
   0xa   :  { %260 = vmatmul.mubr.msk.f32.vlgmr.msra.gmra.mxu0 %vm19_vm0, %v23_v8  ;;  %268 = vmatprep.subr.mxu1 %v118_v9  ;;  %p286_p0 = scmp.ne.s32.totalorder %s221_s11, %s285_s12  ;;  %p291_p2 = scmp.lt.s32.totalorder %s285_s12, %s285_s12 }
   0xb   :  { %269 = vmatpush3.msra.mxu1 %v118_v9 }
   0xc   :  { %270 = vmatprep.subr.mxu1 %v117_v10  ;;  %p292_p3 = por %p291_p2, %p290_p1 }
   0xd   :  { %271 = vmatpush3.msra.mxu1 %v117_v10  ;;  %v113_v19 = vld [vmem:[#allocation2 + $0x8] sm:$0xff] }
   0xe   :  { %272 = vmatprep.subr.mxu1 %v116_v11  ;;  %v112_v21 = vld [vmem:[#allocation2] sm:$0xff]  ;;  %p293_p4 = pnand %p292_p3, %p286_p0 }
   0xf   :  { %273 = vmatpush3.msra.mxu1 %v116_v11 }
  0x10   :  { %274 = vmatprep.subr.mxu1 %v115_v12 }
  0x11   :  { %275 = vmatpush3.msra.mxu1 %v115_v12 }
  0x12   :  { %276 = vmatprep.subr.mxu1 %v114_v13 }
  0x13   :  { %277 = vmatpush3.msra.mxu1 %v114_v13 }
  0xca   :  { %v261_v15 = vpop.f32.mrf.mxu0 }
  0xcb   :  { %v111_v18 = vmax.f32 %v261_v15, 0.0 }
  0xcc   :  { %v101_v16 = vpop.f32.mrf.mxu0 }
  0xcd   :  { %v110_v17 = vmax.f32 %v101_v16, 0.0 }
  0xcf   :  { %278 = vmatprep.mubr.msk.f32.mxu1 %vm122_vm1, %v110_v17 }
  0xd0   :  { %279 = vmatmul.mubr.msk.f32.vlgmr.msra.gmra.mxu1 %vm122_vm1, %v111_v18 }
 0x190   :  { %v280_v20 = vpop.f32.mrf.mxu1 }
 0x191   :  { %v205_v22 = vadd.f32 %v280_v20, %v113_v19 }
 0x192   :  { %v195_v23 = vpop.f32.mrf.mxu1 }
 0x193   :  { %207 = vst.msk [vmem:[#allocation2 + $0x8] sm:$0xff] %vm19_vm0, %v205_v22  ;;  %v204_v24 = vadd.f32 %v195_v23, %v112_v21 }
 0x195   :  { %206 = vst.msk [vmem:[#allocation2] sm:$0xff] %vm19_vm0, %v204_v24 }
 0x19a   :  { %v212_v25 = vld [vmem:[#allocation2 + $0x8] sm:$0xff] }
 0x19b   :  { %214 = vst.msk [vmem:[#allocation3 + $0x8] sm:$0xff] %vm19_vm0, %v212_v25 }
 0x19c   :  { %v211_v26 = vld [vmem:[#allocation2] sm:$0xff] }
 0x19d   :  { %213 = vst.msk [vmem:[#allocation3] sm:$0xff] %vm19_vm0, %v211_v26 }
 0x19e   :  { %296 = shalt.err (!%p293_p4)
}
 0x19f   :  { %s309_s13 = smov 128   ;;  %s310_s14 = smov 8  }
 0x1a0   :  { %226 = dma.vmem_to_hbm [thread:$0]  %s221_s11, 256, %s387_s3, [#allocation4], %s309_s13, %s309_s13, %s310_s14  }
 0x1a1   :  { %305 = dma.done.wait [#allocation4], 256  }
 0x1a2   :  { %306 = vsyncadd [#allocation4], 4294967040 }
 0x1a3   :  { %230 = vsyncpa [#allocation4], 1 }

</bundles_post_ra>
